<compile_context>
chip_gen: v7x
topology: tpu7x:2x2x1
jax: 0.10.0
libtpu: 0.0.40
codegen_flags: <defaults>
</compile_context>

<pallas_src>
import functools

import jax
import jax.numpy as jnp
from jax import lax
from jax.experimental import pallas as pl
from jax.experimental.pallas import tpu as pltpu


def _round_up(x, m):
    return (x + m - 1) // m * m


_COMPILER_PARAMS = pltpu.CompilerParams(
    dimension_semantics=("parallel",),          # batch grid axis -> megacore / 2 TCs
    vmem_limit_bytes=32 * 1024 * 1024,          # raise v5e's 16 MiB default, safe on all gens
)


# ---------------------------------------------------------------------------
# Pallas kernels
# ---------------------------------------------------------------------------
def _accum_3x3(x_refs, w_ref, *, stride, ho, wo):
    """Sum of 9 shifted matmuls (bf16 x bf16 -> f32 accumulate).

    x_refs: tuple of stride*stride phase refs, each (1, he, we, cin) bf16, where
            phase[(kh%s)*s + (kw%s)][0, oh + kh//s, ow + kw//s, :] is the padded
            input pixel feeding output (oh, ow) through tap (kh, kw).
    w_ref : (9, cin, cout) bf16.
    Returns (ho*wo, cout) f32.
    """
    cout = w_ref.shape[-1]
    cin = x_refs[0].shape[-1]
    acc = jnp.zeros((ho * wo, cout), jnp.float32)
    for kh in range(3):
        for kw in range(3):
            phase = (kh % stride) * stride + (kw % stride)
            dh, dw = kh // stride, kw // stride
            xs = x_refs[phase][0, dh:dh + ho, dw:dw + wo, :]
            acc = acc + jnp.dot(xs.reshape(ho * wo, cin),
                                w_ref[kh * 3 + kw],
                                preferred_element_type=jnp.float32)
    return acc


def _conv_bn_relu_kernel(*refs, stride, ho, wo):
    """conv3x3(stride) + folded BN affine + ReLU.  refs = phases..., w, s, t, out."""
    nph = stride * stride
    x_refs = refs[:nph]
    w_ref, s_ref, t_ref, o_ref = refs[nph:]
    acc = _accum_3x3(x_refs, w_ref, stride=stride, ho=ho, wo=wo)
    y = jnp.maximum(acc * s_ref[...] + t_ref[...], 0.0)
    o_ref[...] = y[None].astype(o_ref.dtype)


def _conv_bn_add_relu_kernel(x_ref, w_ref, s_ref, t_ref, r_ref, o_ref, *, ho, wo):
    """conv3x3(stride 1) + BN + identity-residual add + ReLU."""
    acc = _accum_3x3((x_ref,), w_ref, stride=1, ho=ho, wo=wo)
    y = acc * s_ref[...] + t_ref[...] + r_ref[0].astype(jnp.float32)
    o_ref[...] = jnp.maximum(y, 0.0)[None].astype(o_ref.dtype)


def _conv_bn_proj_add_relu_kernel(x_ref, w_ref, s_ref, t_ref,
                                  xs_ref, wsc_ref, ssc_ref, tsc_ref,
                                  o_ref, *, ho, wo):
    """conv3x3(stride 1) + BN + fused 1x1-conv shortcut (+BN) + add + ReLU."""
    acc = _accum_3x3((x_ref,), w_ref, stride=1, ho=ho, wo=wo)
    y = acc * s_ref[...] + t_ref[...]
    res = jnp.dot(xs_ref[0], wsc_ref[...], preferred_element_type=jnp.float32)
    y = y + res * ssc_ref[...] + tsc_ref[...]
    o_ref[...] = jnp.maximum(y, 0.0)[None].astype(o_ref.dtype)


# ---------------------------------------------------------------------------
# pallas_call wrappers
# ---------------------------------------------------------------------------
def _full_spec(shape):
    nd = len(shape)
    return pl.BlockSpec(tuple(shape), lambda i: (0,) * nd)


def _batch_spec(shape_tail):
    nd = len(shape_tail) + 1
    return pl.BlockSpec((1,) + tuple(shape_tail), lambda i: (i,) + (0,) * (nd - 1))


def _conv1(phases, w, s, t, *, stride, ho, wo):
    n = phases[0].shape[0]
    he, we, cin = phases[0].shape[1:]
    cout = w.shape[-1]
    kernel = functools.partial(_conv_bn_relu_kernel, stride=stride, ho=ho, wo=wo)
    in_specs = ([_batch_spec((he, we, cin))] * len(phases)
                + [_full_spec(w.shape), _full_spec(s.shape), _full_spec(t.shape)])
    cost = pl.CostEstimate(
        flops=2 * n * ho * wo * 9 * cin * cout,
        transcendentals=0,
        bytes_accessed=int(sum(p.size for p in phases) * 2 + w.size * 2
                           + (s.size + t.size) * 4 + n * ho * wo * cout * 2))
    return pl.pallas_call(
        kernel,
        out_shape=jax.ShapeDtypeStruct((n, ho * wo, cout), jnp.bfloat16),
        grid=(n,),
        in_specs=in_specs,
        out_specs=_batch_spec((ho * wo, cout)),
        compiler_params=_COMPILER_PARAMS,
        cost_estimate=cost,
    )(*phases, w, s, t)


def _conv2_identity(x2, w, s, t, r, *, ho, wo):
    n = x2.shape[0]
    hp, wp, cin = x2.shape[1:]
    cout = w.shape[-1]
    kernel = functools.partial(_conv_bn_add_relu_kernel, ho=ho, wo=wo)
    in_specs = [_batch_spec((hp, wp, cin)), _full_spec(w.shape),
                _full_spec(s.shape), _full_spec(t.shape),
                _batch_spec((ho * wo, cout))]
    cost = pl.CostEstimate(
        flops=2 * n * ho * wo * 9 * cin * cout,
        transcendentals=0,
        bytes_accessed=int(x2.size * 2 + w.size * 2 + (s.size + t.size) * 4
                           + r.size * 2 + n * ho * wo * cout * 2))
    return pl.pallas_call(
        kernel,
        out_shape=jax.ShapeDtypeStruct((n, ho * wo, cout), jnp.bfloat16),
        grid=(n,),
        in_specs=in_specs,
        out_specs=_batch_spec((ho * wo, cout)),
        compiler_params=_COMPILER_PARAMS,
        cost_estimate=cost,
    )(x2, w, s, t, r)


def _conv2_proj(x2, w, s, t, xs, wsc, ssc, tsc, *, ho, wo):
    n = x2.shape[0]
    hp, wp, cin = x2.shape[1:]
    cin_sc = xs.shape[-1]
    cout = w.shape[-1]
    kernel = functools.partial(_conv_bn_proj_add_relu_kernel, ho=ho, wo=wo)
    in_specs = [_batch_spec((hp, wp, cin)), _full_spec(w.shape),
                _full_spec(s.shape), _full_spec(t.shape),
                _batch_spec((ho * wo, cin_sc)), _full_spec(wsc.shape),
                _full_spec(ssc.shape), _full_spec(tsc.shape)]
    cost = pl.CostEstimate(
        flops=2 * n * ho * wo * (9 * cin + cin_sc) * cout,
        transcendentals=0,
        bytes_accessed=int(x2.size * 2 + w.size * 2 + xs.size * 2 + wsc.size * 2
                           + (s.size + t.size + ssc.size + tsc.size) * 4
                           + n * ho * wo * cout * 2))
    return pl.pallas_call(
        kernel,
        out_shape=jax.ShapeDtypeStruct((n, ho * wo, cout), jnp.bfloat16),
        grid=(n,),
        in_specs=in_specs,
        out_specs=_batch_spec((ho * wo, cout)),
        compiler_params=_COMPILER_PARAMS,
        cost_estimate=cost,
    )(x2, w, s, t, xs, wsc, ssc, tsc)


# ---------------------------------------------------------------------------
# Plain-JAX glue: BN/bias folding, channel padding, phase decomposition
# ---------------------------------------------------------------------------
def _fold_bn_bias(bn, bias, cout_p, eps=1e-5):
    """Fold conv bias + eval-mode BN into y = conv * scale + shift, zero-padded."""
    scale = bn["gamma"] / jnp.sqrt(bn["var"] + eps)
    shift = bn["beta"] + (bias - bn["mean"]) * scale
    c = scale.shape[0]
    s = jnp.zeros((1, cout_p), jnp.float32).at[0, :c].set(scale)
    t = jnp.zeros((1, cout_p), jnp.float32).at[0, :c].set(shift)
    return s, t


def _pack_w3x3(w, cin_p, cout_p):
    kh, kw, cin, cout = w.shape
    wp = jnp.zeros((kh * kw, cin_p, cout_p), jnp.float32)
    wp = wp.at[:, :cin, :cout].set(w.reshape(kh * kw, cin, cout))
    return wp.astype(jnp.bfloat16)


def _pack_w1x1(w, cin_p, cout_p):
    cin, cout = w.shape
    wp = jnp.zeros((cin_p, cout_p), jnp.float32).at[:cin, :cout].set(w)
    return wp.astype(jnp.bfloat16)


def _pad_channels(x, cp):
    pad = cp - x.shape[-1]
    if pad == 0:
        return x
    return jnp.pad(x, ((0, 0),) * (x.ndim - 1) + ((0, pad),))


def _conv_phases(x, *, stride, ho, wo, cin_p, padding=1):
    """Space-to-depth phase views of the zero-padded input (single copy, no 9x blowup).

    phase[(kh%s)*s + (kw%s)][n, oh + kh//s, ow + kw//s, :] == padded_x[n, s*oh+kh, s*ow+kw, :]
    """
    n, h, w, cin = x.shape
    e = max(1, -(-2 // stride))                 # halo rows: 2 for stride 1, 1 for stride 2
    hp, wp = stride * (ho + e), stride * (wo + e)
    xp = jnp.zeros((n, hp, wp, cin_p), x.dtype)
    xp = xp.at[:, padding:padding + h, padding:padding + w, :cin].set(x)
    xp = xp.astype(jnp.bfloat16)
    return [xp[:, ph::stride, pw::stride, :]
            for ph in range(stride) for pw in range(stride)]


def init_basic_block_params(key, in_planes, planes, stride):
    ks = list(jax.random.split(key, 18))
    k = iter(ks)

    def conv_w(kk, kh, kw, cin, cout):
        fan_in = kh * kw * cin
        return jax.random.normal(kk, (kh, kw, cin, cout), jnp.float32) / jnp.sqrt(fan_in)

    def bn_params():
        return dict(
            gamma=1.0 + 0.1 * jax.random.normal(next(k), (planes,), jnp.float32),
            beta=0.1 * jax.random.normal(next(k), (planes,), jnp.float32),
            mean=0.1 * jax.random.normal(next(k), (planes,), jnp.float32),
            var=jnp.abs(1.0 + 0.1 * jax.random.normal(next(k), (planes,), jnp.float32)),
        )

    params = dict(
        w1=conv_w(next(k), 3, 3, in_planes, planes),
        b1=0.1 * jax.random.normal(next(k), (planes,), jnp.float32),
        bn1=bn_params(),
        w2=conv_w(next(k), 3, 3, planes, planes),
        b2=0.1 * jax.random.normal(next(k), (planes,), jnp.float32),
        bn2=bn_params(),
    )
    if stride != 1 or in_planes != planes:
        params["wsc"] = conv_w(next(k), 1, 1, in_planes, planes)
        params["bsc"] = 0.1 * jax.random.normal(next(k), (planes,), jnp.float32)
        params["bnsc"] = bn_params()
    return params


def basic_block_forward(x_nchw, params, stride):
    """Mirrors BasicBlock.forward (eval-mode BN). NCHW input/output like PyTorch."""
    x = jnp.transpose(x_nchw, (0, 2, 3, 1)).astype(jnp.float32)       # -> NHWC
    n, h, w, cin = x.shape
    planes = params["w1"].shape[-1]

    cin_p = _round_up(cin, 8)            # sublane-friendly contraction dim
    cpl = _round_up(planes, 128)         # lane-dense (>=128) output / conv2 input dim

    ho = (h + 2 - 3) // stride + 1
    wo = (w + 2 - 3) // stride + 1

    # --- conv1 (3x3, stride) + bn1 + relu: one fused kernel ----------------
    phases = _conv_phases(x, stride=stride, ho=ho, wo=wo, cin_p=cin_p)
    w1 = _pack_w3x3(params["w1"], cin_p, cpl)
    s1, t1 = _fold_bn_bias(params["bn1"], params["b1"], cpl)
    out1 = _conv1(phases, w1, s1, t1, stride=stride, ho=ho, wo=wo)     # (n, ho*wo, cpl) bf16

    # --- conv2 (3x3, s=1) + bn2 + shortcut + add + relu: one fused kernel --
    x2 = jnp.pad(out1.reshape(n, ho, wo, cpl),
                 ((0, 0), (1, 1), (1, 1), (0, 0)))                     # bf16 halo pad
    w2 = _pack_w3x3(params["w2"], cpl, cpl)
    s2, t2 = _fold_bn_bias(params["bn2"], params["b2"], cpl)

    if "wsc" in params:
        xs = x[:, ::stride, ::stride, :]                               # 1x1-conv sampling
        xs = _pad_channels(xs, cin_p).reshape(n, ho * wo, cin_p).astype(jnp.bfloat16)
        wsc = _pack_w1x1(params["wsc"].reshape(cin, planes), cin_p, cpl)
        ssc, tsc = _fold_bn_bias(params["bnsc"], params["bsc"], cpl)
        out = _conv2_proj(x2, w2, s2, t2, xs, wsc, ssc, tsc, ho=ho, wo=wo)
    else:
        r = _pad_channels(x, cpl).reshape(n, ho * wo, cpl).astype(jnp.bfloat16)
        out = _conv2_identity(x2, w2, s2, t2, r, ho=ho, wo=wo)

    out = out.reshape(n, ho, wo, cpl)[..., :planes].astype(jnp.float32)
    return jnp.transpose(out, (0, 3, 1, 2))                           # -> NCHW


# ---------------------------------------------------------------------------
# Pure-JAX reference (same bf16-storage / f32-accumulate policy as the kernels)
# ---------------------------------------------------------------------------
def _bf16(x):
    return x.astype(jnp.bfloat16).astype(jnp.float32)


def _conv_ref(x, w, stride, padding):
    return lax.conv_general_dilated(
        x, w, window_strides=(stride, stride),
        padding=[(padding, padding), (padding, padding)],
        dimension_numbers=("NHWC", "HWIO", "NHWC"),
        preferred_element_type=jnp.float32)


def _bn_ref(y, bias, bn, eps=1e-5):
    return (y + bias - bn["mean"]) / jnp.sqrt(bn["var"] + eps) * bn["gamma"] + bn["beta"]


def basic_block_reference(x_nchw, params, stride):
    x = _bf16(jnp.transpose(x_nchw, (0, 2, 3, 1)).astype(jnp.float32))
    out = jax.nn.relu(_bn_ref(_conv_ref(x, _bf16(params["w1"]), stride, 1),
                              params["b1"], params["bn1"]))
    out = _bf16(out)                                  # bf16 layer-boundary round
    out = _bn_ref(_conv_ref(out, _bf16(params["w2"]), 1, 1),
                  params["b2"], params["bn2"])
    if "wsc" in params:
        sc = _bn_ref(_conv_ref(x, _bf16(params["wsc"]), stride, 0),
                     params["bsc"], params["bnsc"])
    else:
        sc = x
    out = _bf16(jax.nn.relu(out + sc))
    return jnp.transpose(out, (0, 3, 1, 2))


# ---------------------------------------------------------------------------
if __name__ == "__main__":
    key = jax.random.PRNGKey(0)
    k_x, k_p, k_x2, k_p2 = jax.random.split(key, 4)

    # Case 1: downsampling block (stride 2, channel expansion) -> projection shortcut.
    N, IN_PLANES, PLANES, STRIDE, H, W = 2, 4, 8, 2, 16, 16
    x = jax.random.normal(k_x, (N, IN_PLANES, H, W), jnp.float32)     # NCHW input
    params = init_basic_block_params(k_p, IN_PLANES, PLANES, STRIDE)

    out = jax.block_until_ready(basic_block_forward(x, params, STRIDE))
    assert out.shape == (N, PLANES, H // STRIDE, W // STRIDE), out.shape
    ref = jax.block_until_ready(basic_block_reference(x, params, STRIDE))
    err = float(jnp.max(jnp.abs(out - ref)))
    assert jnp.allclose(out, ref, rtol=1e-2, atol=1e-2), err

    # Case 2: identity-shortcut block (stride 1, in_planes == planes).
    N2, PLANES2, H2, W2 = 2, 8, 16, 16
    x2 = jax.random.normal(k_x2, (N2, PLANES2, H2, W2), jnp.float32)
    params2 = init_basic_block_params(k_p2, PLANES2, PLANES2, 1)

    out2 = jax.block_until_ready(basic_block_forward(x2, params2, 1))
    assert out2.shape == (N2, PLANES2, H2, W2), out2.shape
    ref2 = jax.block_until_ready(basic_block_reference(x2, params2, 1))
    err2 = float(jnp.max(jnp.abs(out2 - ref2)))
    assert jnp.allclose(out2, ref2, rtol=1e-2, atol=1e-2), err2

    print("KERNEL_OK")
</pallas_src>

<mosaic_0001>
module attributes {stable_mosaic.version = 11 : i64} {
  func.func @_conv_bn_relu_kernel(%arg0: i32, %arg1: memref<1x9x9x8xbf16, #tpu.memory_space<vmem>>, %arg2: memref<1x9x9x8xbf16, #tpu.memory_space<vmem>>, %arg3: memref<1x9x9x8xbf16, #tpu.memory_space<vmem>>, %arg4: memref<1x9x9x8xbf16, #tpu.memory_space<vmem>>, %arg5: memref<9x8x128xbf16, #tpu.memory_space<vmem>>, %arg6: memref<1x128xf32, #tpu.memory_space<vmem>>, %arg7: memref<1x128xf32, #tpu.memory_space<vmem>>, %arg8: memref<1x64x128xbf16, #tpu.memory_space<vmem>>) attributes {dimension_semantics = [#tpu.dimension_semantics<parallel>], iteration_bounds = array<i64: 2>, scalar_prefetch = 0 : i64, scratch_operands = 0 : i64, tpu.core_type = #tpu.core_type<tc>, window_params = [{transform_indices = @transform_0, window_bounds = array<i64: 1, 9, 9, 8>}, {transform_indices = @transform_1, window_bounds = array<i64: 1, 9, 9, 8>}, {transform_indices = @transform_2, window_bounds = array<i64: 1, 9, 9, 8>}, {transform_indices = @transform_3, window_bounds = array<i64: 1, 9, 9, 8>}, {pipeline_mode = #tpu.pipeline_mode<synchronous>, transform_indices = @transform_4, window_bounds = array<i64: 9, 8, 128>}, {pipeline_mode = #tpu.pipeline_mode<synchronous>, transform_indices = @transform_5, window_bounds = array<i64: 1, 128>}, {pipeline_mode = #tpu.pipeline_mode<synchronous>, transform_indices = @transform_6, window_bounds = array<i64: 1, 128>}, {transform_indices = @transform_7, window_bounds = array<i64: 1, 64, 128>}]} {
    %cst = arith.constant 0.000000e+00 : f32
    %0 = vector.broadcast %cst : f32 to vector<64x128xf32>
    %c0 = arith.constant 0 : index
    %c0_0 = arith.constant 0 : index
    %c0_1 = arith.constant 0 : index
    %c0_2 = arith.constant 0 : index
    %1 = vector.load %arg1[%c0, %c0_0, %c0_1, %c0_2] : memref<1x9x9x8xbf16, #tpu.memory_space<vmem>>, vector<1x8x8x8xbf16>
    %2 = vector.shape_cast %1 : vector<1x8x8x8xbf16> to vector<8x8x8xbf16>
    %3 = vector.shape_cast %2 : vector<8x8x8xbf16> to vector<64x8xbf16>
    %c0_3 = arith.constant 0 : index
    %c0_4 = arith.constant 0 : index
    %c0_5 = arith.constant 0 : index
    %4 = vector.load %arg5[%c0_3, %c0_4, %c0_5] : memref<9x8x128xbf16, #tpu.memory_space<vmem>>, vector<1x8x128xbf16>
    %5 = vector.shape_cast %4 : vector<1x8x128xbf16> to vector<8x128xbf16>
    %cst_6 = arith.constant dense<0.000000e+00> : vector<64x128xf32>
    %6 = tpu.matmul %3, %5, %cst_6 {dimension_numbers = #tpu.dot_dimension_numbers<[1], [0], [0], [1], [0, 0, 1, 1], [], []>} : vector<64x8xbf16>, vector<8x128xbf16>, vector<64x128xf32> -> vector<64x128xf32>
    %7 = arith.addf %0, %6 : vector<64x128xf32>
    %c0_7 = arith.constant 0 : index
    %c0_8 = arith.constant 0 : index
    %c0_9 = arith.constant 0 : index
    %c0_10 = arith.constant 0 : index
    %8 = vector.load %arg2[%c0_7, %c0_8, %c0_9, %c0_10] : memref<1x9x9x8xbf16, #tpu.memory_space<vmem>>, vector<1x8x8x8xbf16>
    %9 = vector.shape_cast %8 : vector<1x8x8x8xbf16> to vector<8x8x8xbf16>
    %10 = vector.shape_cast %9 : vector<8x8x8xbf16> to vector<64x8xbf16>
    %c1 = arith.constant 1 : index
    %c0_11 = arith.constant 0 : index
    %c0_12 = arith.constant 0 : index
    %11 = vector.load %arg5[%c1, %c0_11, %c0_12] : memref<9x8x128xbf16, #tpu.memory_space<vmem>>, vector<1x8x128xbf16>
    %12 = vector.shape_cast %11 : vector<1x8x128xbf16> to vector<8x128xbf16>
    %cst_13 = arith.constant dense<0.000000e+00> : vector<64x128xf32>
    %13 = tpu.matmul %10, %12, %cst_13 {dimension_numbers = #tpu.dot_dimension_numbers<[1], [0], [0], [1], [0, 0, 1, 1], [], []>} : vector<64x8xbf16>, vector<8x128xbf16>, vector<64x128xf32> -> vector<64x128xf32>
    %14 = arith.addf %7, %13 : vector<64x128xf32>
    %c0_14 = arith.constant 0 : index
    %c0_15 = arith.constant 0 : index
    %c1_16 = arith.constant 1 : index
    %c0_17 = arith.constant 0 : index
    %15 = vector.load %arg1[%c0_14, %c0_15, %c1_16, %c0_17] : memref<1x9x9x8xbf16, #tpu.memory_space<vmem>>, vector<1x8x8x8xbf16>
    %16 = vector.shape_cast %15 : vector<1x8x8x8xbf16> to vector<8x8x8xbf16>
    %17 = vector.shape_cast %16 : vector<8x8x8xbf16> to vector<64x8xbf16>
    %c2 = arith.constant 2 : index
    %c0_18 = arith.constant 0 : index
    %c0_19 = arith.constant 0 : index
    %18 = vector.load %arg5[%c2, %c0_18, %c0_19] : memref<9x8x128xbf16, #tpu.memory_space<vmem>>, vector<1x8x128xbf16>
    %19 = vector.shape_cast %18 : vector<1x8x128xbf16> to vector<8x128xbf16>
    %cst_20 = arith.constant dense<0.000000e+00> : vector<64x128xf32>
    %20 = tpu.matmul %17, %19, %cst_20 {dimension_numbers = #tpu.dot_dimension_numbers<[1], [0], [0], [1], [0, 0, 1, 1], [], []>} : vector<64x8xbf16>, vector<8x128xbf16>, vector<64x128xf32> -> vector<64x128xf32>
    %21 = arith.addf %14, %20 : vector<64x128xf32>
    %c0_21 = arith.constant 0 : index
    %c0_22 = arith.constant 0 : index
    %c0_23 = arith.constant 0 : index
    %c0_24 = arith.constant 0 : index
    %22 = vector.load %arg3[%c0_21, %c0_22, %c0_23, %c0_24] : memref<1x9x9x8xbf16, #tpu.memory_space<vmem>>, vector<1x8x8x8xbf16>
    %23 = vector.shape_cast %22 : vector<1x8x8x8xbf16> to vector<8x8x8xbf16>
    %24 = vector.shape_cast %23 : vector<8x8x8xbf16> to vector<64x8xbf16>
    %c3 = arith.constant 3 : index
    %c0_25 = arith.constant 0 : index
    %c0_26 = arith.constant 0 : index
    %25 = vector.load %arg5[%c3, %c0_25, %c0_26] : memref<9x8x128xbf16, #tpu.memory_space<vmem>>, vector<1x8x128xbf16>
    %26 = vector.shape_cast %25 : vector<1x8x128xbf16> to vector<8x128xbf16>
    %cst_27 = arith.constant dense<0.000000e+00> : vector<64x128xf32>
    %27 = tpu.matmul %24, %26, %cst_27 {dimension_numbers = #tpu.dot_dimension_numbers<[1], [0], [0], [1], [0, 0, 1, 1], [], []>} : vector<64x8xbf16>, vector<8x128xbf16>, vector<64x128xf32> -> vector<64x128xf32>
    %28 = arith.addf %21, %27 : vector<64x128xf32>
    %c0_28 = arith.constant 0 : index
    %c0_29 = arith.constant 0 : index
    %c0_30 = arith.constant 0 : index
    %c0_31 = arith.constant 0 : index
    %29 = vector.load %arg4[%c0_28, %c0_29, %c0_30, %c0_31] : memref<1x9x9x8xbf16, #tpu.memory_space<vmem>>, vector<1x8x8x8xbf16>
    %30 = vector.shape_cast %29 : vector<1x8x8x8xbf16> to vector<8x8x8xbf16>
    %31 = vector.shape_cast %30 : vector<8x8x8xbf16> to vector<64x8xbf16>
    %c4 = arith.constant 4 : index
    %c0_32 = arith.constant 0 : index
    %c0_33 = arith.constant 0 : index
    %32 = vector.load %arg5[%c4, %c0_32, %c0_33] : memref<9x8x128xbf16, #tpu.memory_space<vmem>>, vector<1x8x128xbf16>
    %33 = vector.shape_cast %32 : vector<1x8x128xbf16> to vector<8x128xbf16>
    %cst_34 = arith.constant dense<0.000000e+00> : vector<64x128xf32>
    %34 = tpu.matmul %31, %33, %cst_34 {dimension_numbers = #tpu.dot_dimension_numbers<[1], [0], [0], [1], [0, 0, 1, 1], [], []>} : vector<64x8xbf16>, vector<8x128xbf16>, vector<64x128xf32> -> vector<64x128xf32>
    %35 = arith.addf %28, %34 : vector<64x128xf32>
    %c0_35 = arith.constant 0 : index
    %c0_36 = arith.constant 0 : index
    %c1_37 = arith.constant 1 : index
    %c0_38 = arith.constant 0 : index
    %36 = vector.load %arg3[%c0_35, %c0_36, %c1_37, %c0_38] : memref<1x9x9x8xbf16, #tpu.memory_space<vmem>>, vector<1x8x8x8xbf16>
    %37 = vector.shape_cast %36 : vector<1x8x8x8xbf16> to vector<8x8x8xbf16>
    %38 = vector.shape_cast %37 : vector<8x8x8xbf16> to vector<64x8xbf16>
    %c5 = arith.constant 5 : index
    %c0_39 = arith.constant 0 : index
    %c0_40 = arith.constant 0 : index
    %39 = vector.load %arg5[%c5, %c0_39, %c0_40] : memref<9x8x128xbf16, #tpu.memory_space<vmem>>, vector<1x8x128xbf16>
    %40 = vector.shape_cast %39 : vector<1x8x128xbf16> to vector<8x128xbf16>
    %cst_41 = arith.constant dense<0.000000e+00> : vector<64x128xf32>
    %41 = tpu.matmul %38, %40, %cst_41 {dimension_numbers = #tpu.dot_dimension_numbers<[1], [0], [0], [1], [0, 0, 1, 1], [], []>} : vector<64x8xbf16>, vector<8x128xbf16>, vector<64x128xf32> -> vector<64x128xf32>
    %42 = arith.addf %35, %41 : vector<64x128xf32>
    %c0_42 = arith.constant 0 : index
    %c1_43 = arith.constant 1 : index
    %c0_44 = arith.constant 0 : index
    %c0_45 = arith.constant 0 : index
    %43 = vector.load %arg1[%c0_42, %c1_43, %c0_44, %c0_45] : memref<1x9x9x8xbf16, #tpu.memory_space<vmem>>, vector<1x8x8x8xbf16>
    %44 = vector.shape_cast %43 : vector<1x8x8x8xbf16> to vector<8x8x8xbf16>
    %45 = vector.shape_cast %44 : vector<8x8x8xbf16> to vector<64x8xbf16>
    %c6 = arith.constant 6 : index
    %c0_46 = arith.constant 0 : index
    %c0_47 = arith.constant 0 : index
    %46 = vector.load %arg5[%c6, %c0_46, %c0_47] : memref<9x8x128xbf16, #tpu.memory_space<vmem>>, vector<1x8x128xbf16>
    %47 = vector.shape_cast %46 : vector<1x8x128xbf16> to vector<8x128xbf16>
    %cst_48 = arith.constant dense<0.000000e+00> : vector<64x128xf32>
    %48 = tpu.matmul %45, %47, %cst_48 {dimension_numbers = #tpu.dot_dimension_numbers<[1], [0], [0], [1], [0, 0, 1, 1], [], []>} : vector<64x8xbf16>, vector<8x128xbf16>, vector<64x128xf32> -> vector<64x128xf32>
    %49 = arith.addf %42, %48 : vector<64x128xf32>
    %c0_49 = arith.constant 0 : index
    %c1_50 = arith.constant 1 : index
    %c0_51 = arith.constant 0 : index
    %c0_52 = arith.constant 0 : index
    %50 = vector.load %arg2[%c0_49, %c1_50, %c0_51, %c0_52] : memref<1x9x9x8xbf16, #tpu.memory_space<vmem>>, vector<1x8x8x8xbf16>
    %51 = vector.shape_cast %50 : vector<1x8x8x8xbf16> to vector<8x8x8xbf16>
    %52 = vector.shape_cast %51 : vector<8x8x8xbf16> to vector<64x8xbf16>
    %c7 = arith.constant 7 : index
    %c0_53 = arith.constant 0 : index
    %c0_54 = arith.constant 0 : index
    %53 = vector.load %arg5[%c7, %c0_53, %c0_54] : memref<9x8x128xbf16, #tpu.memory_space<vmem>>, vector<1x8x128xbf16>
    %54 = vector.shape_cast %53 : vector<1x8x128xbf16> to vector<8x128xbf16>
    %cst_55 = arith.constant dense<0.000000e+00> : vector<64x128xf32>
    %55 = tpu.matmul %52, %54, %cst_55 {dimension_numbers = #tpu.dot_dimension_numbers<[1], [0], [0], [1], [0, 0, 1, 1], [], []>} : vector<64x8xbf16>, vector<8x128xbf16>, vector<64x128xf32> -> vector<64x128xf32>
    %56 = arith.addf %49, %55 : vector<64x128xf32>
    %c0_56 = arith.constant 0 : index
    %c1_57 = arith.constant 1 : index
    %c1_58 = arith.constant 1 : index
    %c0_59 = arith.constant 0 : index
    %57 = vector.load %arg1[%c0_56, %c1_57, %c1_58, %c0_59] : memref<1x9x9x8xbf16, #tpu.memory_space<vmem>>, vector<1x8x8x8xbf16>
    %58 = vector.shape_cast %57 : vector<1x8x8x8xbf16> to vector<8x8x8xbf16>
    %59 = vector.shape_cast %58 : vector<8x8x8xbf16> to vector<64x8xbf16>
    %c8 = arith.constant 8 : index
    %c0_60 = arith.constant 0 : index
    %c0_61 = arith.constant 0 : index
    %60 = vector.load %arg5[%c8, %c0_60, %c0_61] : memref<9x8x128xbf16, #tpu.memory_space<vmem>>, vector<1x8x128xbf16>
    %61 = vector.shape_cast %60 : vector<1x8x128xbf16> to vector<8x128xbf16>
    %cst_62 = arith.constant dense<0.000000e+00> : vector<64x128xf32>
    %62 = tpu.matmul %59, %61, %cst_62 {dimension_numbers = #tpu.dot_dimension_numbers<[1], [0], [0], [1], [0, 0, 1, 1], [], []>} : vector<64x8xbf16>, vector<8x128xbf16>, vector<64x128xf32> -> vector<64x128xf32>
    %63 = arith.addf %56, %62 : vector<64x128xf32>
    %c0_63 = arith.constant 0 : index
    %c0_64 = arith.constant 0 : index
    %64 = vector.load %arg6[%c0_63, %c0_64] : memref<1x128xf32, #tpu.memory_space<vmem>>, vector<1x128xf32>
    %65 = vector.broadcast %64 : vector<1x128xf32> to vector<64x128xf32>
    %66 = arith.mulf %63, %65 : vector<64x128xf32>
    %c0_65 = arith.constant 0 : index
    %c0_66 = arith.constant 0 : index
    %67 = vector.load %arg7[%c0_65, %c0_66] : memref<1x128xf32, #tpu.memory_space<vmem>>, vector<1x128xf32>
    %68 = vector.broadcast %67 : vector<1x128xf32> to vector<64x128xf32>
    %69 = arith.addf %66, %68 : vector<64x128xf32>
    %cst_67 = arith.constant 0.000000e+00 : f32
    %70 = vector.broadcast %cst_67 : f32 to vector<64x128xf32>
    %71 = arith.maximumf %69, %70 : vector<64x128xf32>
    %72 = vector.shape_cast %71 : vector<64x128xf32> to vector<1x64x128xf32>
    %73 = arith.truncf %72 : vector<1x64x128xf32> to vector<1x64x128xbf16>
    %c0_68 = arith.constant 0 : index
    %c0_69 = arith.constant 0 : index
    %c0_70 = arith.constant 0 : index
    %74 = vector.load %arg8[%c0_68, %c0_69, %c0_70] : memref<1x64x128xbf16, #tpu.memory_space<vmem>>, vector<1x64x128xbf16>
    tpu.vector_store %arg8[%c0_68, %c0_69, %c0_70], %73 {strides = array<i32>} : memref<1x64x128xbf16, #tpu.memory_space<vmem>>, vector<1x64x128xbf16>,
    return
  }
  func.func @transform_0(%arg0: i32) -> (i32, i32, i32, i32) {
    %c0_i32 = arith.constant 0 : i32
    %c0_i32_0 = arith.constant 0 : i32
    %c0_i32_1 = arith.constant 0 : i32
    %c0_i32_2 = arith.constant 0 : i32
    return %arg0, %c0_i32, %c0_i32_0, %c0_i32_1 : i32, i32, i32, i32
  }
  func.func @transform_1(%arg0: i32) -> (i32, i32, i32, i32) {
    %c0_i32 = arith.constant 0 : i32
    %c0_i32_0 = arith.constant 0 : i32
    %c0_i32_1 = arith.constant 0 : i32
    %c0_i32_2 = arith.constant 0 : i32
    return %arg0, %c0_i32, %c0_i32_0, %c0_i32_1 : i32, i32, i32, i32
  }
  func.func @transform_2(%arg0: i32) -> (i32, i32, i32, i32) {
    %c0_i32 = arith.constant 0 : i32
    %c0_i32_0 = arith.constant 0 : i32
    %c0_i32_1 = arith.constant 0 : i32
    %c0_i32_2 = arith.constant 0 : i32
    return %arg0, %c0_i32, %c0_i32_0, %c0_i32_1 : i32, i32, i32, i32
  }
  func.func @transform_3(%arg0: i32) -> (i32, i32, i32, i32) {
    %c0_i32 = arith.constant 0 : i32
    %c0_i32_0 = arith.constant 0 : i32
    %c0_i32_1 = arith.constant 0 : i32
    %c0_i32_2 = arith.constant 0 : i32
    return %arg0, %c0_i32, %c0_i32_0, %c0_i32_1 : i32, i32, i32, i32
  }
  func.func @transform_4(%arg0: i32) -> (i32, i32, i32) {
    %c0_i32 = arith.constant 0 : i32
    %c0_i32_0 = arith.constant 0 : i32
    %c0_i32_1 = arith.constant 0 : i32
    %c0_i32_2 = arith.constant 0 : i32
    return %c0_i32, %c0_i32_0, %c0_i32_1 : i32, i32, i32
  }
  func.func @transform_5(%arg0: i32) -> (i32, i32) {
    %c0_i32 = arith.constant 0 : i32
    %c0_i32_0 = arith.constant 0 : i32
    %c0_i32_1 = arith.constant 0 : i32
    return %c0_i32, %c0_i32_0 : i32, i32
  }
  func.func @transform_6(%arg0: i32) -> (i32, i32) {
    %c0_i32 = arith.constant 0 : i32
    %c0_i32_0 = arith.constant 0 : i32
    %c0_i32_1 = arith.constant 0 : i32
    return %c0_i32, %c0_i32_0 : i32, i32
  }
  func.func @transform_7(%arg0: i32) -> (i32, i32, i32) {
    %c0_i32 = arith.constant 0 : i32
    %c0_i32_0 = arith.constant 0 : i32
    %c0_i32_1 = arith.constant 0 : i32
    return %arg0, %c0_i32, %c0_i32_0 : i32, i32, i32
  }
}

</mosaic_0001>

<bundles_post_ra>
// kernel: tpu_custom_call.1
= control target key start
LH: loop header
LB: loop body
LE: loop exit
PB: predicated region body
PF: predicated region fallthrough
CT: control target
= control target key end

     0   :  { %12 = vsyncpa [#allocation3], 0  ;;  %s2839_s0 = inlined_call_operand.vmem [shape: bf16[2,9,9,8], index: 0, kind: input, shape index: {}]   ;;  %s2840_s1 = inlined_call_operand.vmem [shape: bf16[2,9,9,8], index: 1, kind: input, shape index: {}]   ;;  %s2841_s2 = inlined_call_operand.vmem [shape: bf16[2,9,9,8], index: 2, kind: input, shape index: {}]   ;;  %s2842_s3 = inlined_call_operand.vmem [shape: bf16[2,9,9,8], index: 3, kind: input, shape index: {}]   ;;  %s2843_s4 = inlined_call_operand.vmem [shape: bf16[9,8,128], index: 4, kind: input, shape index: {}]   ;;  %s2844_s5 = inlined_call_operand.vmem [shape: f32[1,128], index: 5, kind: input, shape index: {}]   ;;  %s2845_s6 = inlined_call_operand.vmem [shape: f32[1,128], index: 6, kind: input, shape index: {}]   ;;  %s2846_s7 = inlined_call_operand.hbm [shape: bf16[2,64,128], index: 7, kind: output, shape index: {}]  }
   0x1   :  { %14 = vsyncpa [#allocation3 + $0x1], 0  ;;  %s2468_s24 = smov 0   ;;  %s2470_s25 = smov 0  }
   0x2   :  { %s2472_s26 = smov 0   ;;  %s2474_s27 = smov 0  }
   0x3 LB: > { %s2489_s28 = sadd.s32 4294967295, %s2423_s27   ;;  %s1916_s29 = sadd.s32 4294967294, %s2423_s27   ;;  %s2423_s27 = sphi %s2474_s27, %s2854_s27   ;;  %s2419_s26 = sphi %s2472_s26, %s2853_s26   ;;  %s2415_s25 = sphi %s2470_s25, %s2852_s25   ;;  %s2411_s24 = sphi %s2468_s24, %s2851_s24  }
   0x4   : > { %s2493_s30 = sadd.s32 1, %s2423_s27   ;;  %s194_s8 = sadd.s32 1, %s2419_s26 }
   0x5   : > { %s191_s9 = ssub.s32 %s2423_s27, %s2493_s30  ;;  %p204_p0 = scmp.ne.s32.totalorder %s2419_s26, %s2415_s25 }
   0x6   : > { %p192_p1 = scmp.eq.s32.totalorder %s191_s9, 0  ;;  %p205_p2 = scmp.eq.s32.totalorder %s2489_s28, 1 }
   0x7   : > { %p210_p3 = scmp.ne.s32.totalorder %s2415_s25, %s2411_s24  ;;  %p211_p4 = scmp.eq.s32.totalorder %s1916_s29, 1 }
   0x8   : > { %s2504_s10 = scalar_select %p192_p1, %s2419_s26, %s194_s8  }
   0x9   : > { %p2506_p5 = por %p205_p2, %p204_p0  ;;  %p2510_p6 = por %p211_p4, %p210_p3 }
   0xa   : > { %p1919_p7 = scmp.ge.s32.totalorder %s2423_s27, 1  ;;  %p270_p8 = scmp.lt.s32.totalorder %s2423_s27, 3 }
   0xc   : > { %p271_p9 = pnand %p1919_p7, %p270_p8 }
   0xd   : > { %v1925_v0 = vld [vmem:[%s2843_s4 + $0x4] sm:$0xf] (!%p271_p9)  ;;  %vm390_vm0 = vcmask (!%p271_p9), 1043456   ;;  %v2522_v1 = vld [vmem:[%s2843_s4 + $0x10] sm:$0xf] (!%p271_p9)  ;;  %p317_p10 = scmp.lt.s32.totalorder (!%p271_p9), %s2489_s28, 1 }
   0xe   : > { %274 = sbr.rel (%p271_p9) target bundleno = 343 (0x157), region = 48  ;;  %2285 = vmatprep.subr.msk.bf16.mxu1 (!%p271_p9), %vm390_vm0, %v1925_v0  ;;  %2289 = vmatprep.subr.msk.bf16.mxu0 (!%p271_p9), %vm390_vm0, %v2522_v1  ;;  %v392_v2 = vsel (!%p271_p9), %vm390_vm0, %v1925_v0, 0  ;;  %v2531_v3 = vsel (!%p271_p9), %vm390_vm0, %v2522_v1, 0  ;;  %v346_v4 = vld [vmem:[%s2843_s4] sm:$0xf] (!%p271_p9)  ;;  %vm377_vm1 = vcmask (!%p271_p9), 64512  }
   0xf   : > { %2130 = vmatpush3.bf16.msra.mxu1 (!%p271_p9), %v392_v2  ;;  %2170 = vmatpush3.bf16.msra.mxu0 (!%p271_p9), %v2531_v3  ;;  %v1969_v5 = vld [vmem:[%s2843_s4 + $0x14] sm:$0xf] (!%p271_p9)  ;;  %v492_v6 = vsel (!%p271_p9), %vm390_vm0, %v346_v4, 0  ;;  %v1986_v9 = vld [vmem:[%s2843_s4 + $0x18] sm:$0xf] (!%p271_p9)  ;;  %s2425_s18 = smov (!%p271_p9), [#allocation2]  }
  0x10   : > { %2286 = vmatprep.subr.msk.bf16.mxu1 (!%p271_p9), %vm390_vm0, %v346_v4  ;;  %2291 = vmatprep.subr.msk.bf16.mxu0 (!%p271_p9), %vm390_vm0, %v1969_v5  ;;  %v1183_v7 = vsel (!%p271_p9), %vm390_vm0, %v1969_v5, 0  ;;  %v1942_v10 = vld [vmem:[%s2843_s4 + $0x8] sm:$0xf] (!%p271_p9)  ;;  %vm575_vm2 = vsmask.f32 (!%p271_p9), 3328  ;;  %v2581_v15 = vsel (!%p271_p9), %vm390_vm0, %v1986_v9, 0 }
  0x11   : > { %vm576_vm3 = vsmask.f32 (!%p271_p9), 7440  ;;  %v2584_v16 = vsel (!%p271_p9), %vm390_vm0, %v1942_v10, 0 }
  0x12   : > { %vm2607_vm4 = vmor (!%p271_p9), %vm575_vm2, %vm576_vm3 }
  0x15   : > { %s318_s19 = scalar_select %p317_p10, %s2489_s28, 1 }
  0x17   : > { %s2543_s22 = smul.u32 72, %s318_s19 }
  0x19   : > { %s2549_s8 = scalar_lea.vmem %s2840_s1, %s2543_s22  ;;  %s2558_s14 = scalar_lea.vmem %s2842_s3, %s2543_s22 }
  0x1a   : > { %v2337_v8 = vld [vmem:[%s2549_s8] ss:$8 sps:$4 sm:$0xff]   ;;  %v2339_v12 = vld [vmem:[%s2549_s8 + $0x10] ss:$8 sps:$4 sm:$0xff]   ;;  %s2573_s21 = scalar_lea.vmem %s2841_s2, %s2543_s22  ;;  %s2601_s9 = scalar_lea.vmem %s2839_s0, %s2543_s22 }
  0x1b   : > { %v2338_v11 = vld [vmem:[%s2558_s14] ss:$8 sps:$4 sm:$0xff]   ;;  %2131 = vmatprep.mubr.msk.bf16.mxu1 %vm377_vm1, %v2337_v8  ;;  %v2340_v13 = vld [vmem:[%s2558_s14 + $0x10] ss:$8 sps:$4 sm:$0xff]   ;;  %v1029_v19 = vld [vmem:[%s2573_s21 + $0x4] sm:$0x1] }
  0x1c   : > { %2171 = vmatprep.mubr.msk.bf16.mxu0 %vm377_vm1, %v2338_v11  ;;  %2132 = vmatmul.mubr.msk.bf16.vlgmr.msra.gmra.mrb[0].mxu1 %vm377_vm1, %v2339_v12  ;;  %v2341_v14 = vld [vmem:[%s2549_s8 + $0x20] ss:$8 sps:$4 sm:$0xff]   ;;  %v2342_v17 = vld [vmem:[%s2549_s8 + $0x30] ss:$8 sps:$4 sm:$0xff]   ;;  %v1031_v21 = vld [vmem:[%s2573_s21 + $0xc] sm:$0x1] }
  0x1d   : > { %2140 = vmatpush3.bf16.msra.mxu1 %v492_v6  ;;  %2172 = vmatmul.mubr.msk.bf16.vlgmr.msra.gmra.mrb[0].mxu0 %vm377_vm1, %v2340_v13  ;;  %v1028_v18 = vld [vmem:[%s2573_s21] sm:$0xf]  ;;  %v1030_v20 = vld [vmem:[%s2573_s21 + $0x8] sm:$0xf]  ;;  %v1054_v24 = vshll.u32 %v1029_v19, 16  ;;  %v1068_v27 = vshll.u32 %v1031_v21, 16 }
  0x1e   : > { %2180 = vmatpush3.bf16.msra.mxu0 %v1183_v7  ;;  %2135 = vmatprep.mubr.msk.bf16.mxu1 %vm377_vm1, %v2341_v14  ;;  %v1045_v22 = vshrl.u32 %v1028_v18, 16  ;;  %v1048_v23 = vshll.u32 %v1028_v18, 16  ;;  %v1059_v25 = vshrl.u32 %v1030_v20, 16  ;;  %v1062_v26 = vshll.u32 %v1030_v20, 16  ;;  %v1032_v28 = vld [vmem:[%s2573_s21 + $0x10] sm:$0xf] }
  0x1f   : > { %2292 = vmatprep.subr.msk.bf16.mxu0 %vm390_vm0, %v1986_v9  ;;  %2287 = vmatprep.subr.msk.bf16.mxu1 %vm390_vm0, %v1942_v10  ;;  %v1033_v29 = vld [vmem:[%s2573_s21 + $0x14] sm:$0x1]  ;;  %v1056_v32 = vrot.slane %v1054_v24, 5  ;;  %v1034_v34 = vld [vmem:[%s2573_s21 + $0x18] sm:$0xf]  ;;  %v1070_v36 = vrot.slane %v1068_v27, 5 }
  0x20   : > { %v1047_v30 = vrot.slane %v1045_v22, 4  ;;  %v1050_v31 = vrot.slane %v1048_v23, 5  ;;  %v1061_v33 = vrot.slane %v1059_v25, 4  ;;  %v1064_v35 = vrot.slane %v1062_v26, 5  ;;  %v1035_v37 = vld [vmem:[%s2573_s21 + $0x1c] sm:$0x1] }
  0x21   : > { %v1073_v38 = vshrl.u32 %v1032_v28, 16  ;;  %v1076_v39 = vshll.u32 %v1032_v28, 16  ;;  %v1082_v41 = vshll.u32 %v1033_v29, 16  ;;  %v1087_v42 = vshrl.u32 %v1034_v34, 16  ;;  %v2343_v53 = vld [vmem:[%s2601_s9] ss:$8 sps:$4 sm:$0xff]  }
  0x22   : > { %v1051_v40 = vor.u32 %v1050_v31, %v1047_v30  ;;  %v1090_v43 = vshll.u32 %v1034_v34, 16  ;;  %v1065_v45 = vor.u32 %v1064_v35, %v1061_v33  ;;  %v1096_v48 = vshll.u32 %v1035_v37, 16  ;;  %v2344_v59 = vld [vmem:[%s2601_s9 + $0x10] ss:$8 sps:$4 sm:$0xff]   ;;  %v1036_v60 = vld [vmem:[%s2573_s21 + $0x20] sm:$0xf] }
  0x23   : > { %v1075_v46 = vrot.slane %v1073_v38, 4  ;;  %v1078_v47 = vrot.slane %v1076_v39, 5  ;;  %v1084_v50 = vrot.slane %v1082_v41, 5  ;;  %v1089_v51 = vrot.slane %v1087_v42, 4  ;;  %v1037_v61 = vld [vmem:[%s2573_s21 + $0x24] sm:$0x1] }
  0x24   : > { %2136 = vmatmul.mubr.msk.bf16.gmra.mrb[4].mxu1 %vm377_vm1, %v2342_v17  ;;  %v1052_v49 = vrot.slane %v1051_v40, 4  ;;  %v1092_v52 = vrot.slane %v1090_v43, 5  ;;  %v1066_v54 = vrot.slane %v1065_v45, 4  ;;  %v1098_v56 = vrot.slane %v1096_v48, 5  ;;  %v1038_v0 = vld [vmem:[%s2573_s21 + $0x28] sm:$0xf] }
  0x25   : > { %v1079_v55 = vor.u32 %v1078_v47, %v1075_v46  ;;  %2141 = vmatprep.mubr.msk.bf16.mxu1 %vm377_vm1, %v2343_v53  ;;  %v1039_v2 = vld [vmem:[%s2573_s21 + $0x2c] sm:$0x1]  ;;  %v1101_v4 = vshrl.u32 %v1036_v60, 16  ;;  %v1104_v7 = vshll.u32 %v1036_v60, 16  ;;  %v1110_v8 = vshll.u32 %v1037_v61, 16 }
  0x26   : > { %v1057_v57 = vsel %vm2607_vm4, %v1052_v49, %v1056_v32  ;;  %v1093_v58 = vor.u32 %v1092_v52, %v1089_v51  ;;  %v1071_v62 = vsel %vm2607_vm4, %v1066_v54, %v1070_v36  ;;  %v1040_v9 = vld [vmem:[%s2573_s21 + $0x30] sm:$0xf]  ;;  %v2626_v10 = vld [vmem:[%s2843_s4 + $0xc] sm:$0xf]  ;;  %v1115_v13 = vshrl.u32 %v1038_v0, 16 }
  0x27   : > { %v1080_v63 = vrot.slane %v1079_v55, 4  ;;  %v1970_v5 = vcombine.low %v1057_v57, %v1071_v62  ;;  %v1103_v12 = vrot.slane %v1101_v4, 4  ;;  %v1118_v14 = vshll.u32 %v1038_v0, 16  ;;  %v1041_v17 = vld [vmem:[%s2573_s21 + $0x34] sm:$0x1] }
  0x28   : > { %v1094_v6 = vrot.slane %v1093_v58, 4  ;;  %v1106_v19 = vrot.slane %v1104_v7, 5  ;;  %v1112_v20 = vrot.slane %v1110_v8, 5  ;;  %v1124_v21 = vshll.u32 %v1039_v2, 16  ;;  %v1042_v22 = vld [vmem:[%s2573_s21 + $0x38] sm:$0xf] }
  0x29   : > { %v1085_v11 = vsel %vm2607_vm4, %v1080_v63, %v1084_v50  ;;  %2181 = vmatprep.mubr.msk.bf16.mxu0 %vm377_vm1, %v1970_v5  ;;  %v2638_v23 = vld [vmem:[%s2843_s4 + $0x1c] sm:$0xf]  ;;  %v1117_v25 = vrot.slane %v1115_v13, 4  ;;  %v1120_v26 = vrot.slane %v1118_v14, 5  ;;  %v1129_v28 = vshrl.u32 %v1040_v9, 16 }
  0x2a   : > { %v1099_v18 = vsel %vm2607_vm4, %v1094_v6, %v1098_v56  ;;  %v1043_v27 = vld [vmem:[%s2573_s21 + $0x3c] sm:$0x1]  ;;  %v1107_v29 = vor.u32 %v1106_v19, %v1103_v12  ;;  %v1126_v30 = vrot.slane %v1124_v21, 5  ;;  %v1132_v31 = vshll.u32 %v1040_v9, 16  ;;  %v2347_v53 = vld [vmem:[%s2601_s9 + $0x8] ss:$8 sps:$4 sm:$0xff]  }
  0x2b   : > { %v1971_v24 = vcombine.low %v1085_v11, %v1099_v18  ;;  %v1138_v32 = vshll.u32 %v1041_v17, 16  ;;  %v1121_v33 = vor.u32 %v1120_v26, %v1117_v25  ;;  %v1131_v34 = vrot.slane %v1129_v28, 4  ;;  %v559_v54 = vld [vmem:[%s2601_s9] sm:$0xf]  ;;  %v560_v56 = vld [vmem:[%s2601_s9 + $0x4] sm:$0x1] }
  0x2c   : > { %2142 = vmatmul.mubr.msk.bf16.vlgmr.msra.gmra.mrb[0].mxu1 %vm377_vm1, %v2344_v59  ;;  %v1143_v35 = vshrl.u32 %v1042_v22, 16  ;;  %v1146_v36 = vshll.u32 %v1042_v22, 16  ;;  %v1108_v37 = vrot.slane %v1107_v29, 4  ;;  %v1134_v38 = vrot.slane %v1132_v31, 5  ;;  %v561_v57 = vld [vmem:[%s2601_s9 + $0x8] sm:$0xf] }
  0x2d   : > { %2150 = vmatpush3.bf16.msra.mxu1 %v2584_v16  ;;  %2182 = vmatmul.mubr.msk.bf16.vlgmr.msra.gmra.mrb[0].mxu0 %vm377_vm1, %v1971_v24  ;;  %v1152_v39 = vshll.u32 %v1043_v27, 16  ;;  %v2345_v16 = vld [vmem:[%s2601_s9 + $0x20] ss:$8 sps:$4 sm:$0xff]   ;;  %v1122_v40 = vrot.slane %v1121_v33, 4  ;;  %v1140_v46 = vrot.slane %v1138_v32, 5  ;;  %v579_v60 = vshrl.u32 %v559_v54, 16 }
  0x2e   : > { %2288 = vmatprep.subr.msk.bf16.mxu1 %vm390_vm0, %v2626_v10  ;;  %2190 = vmatpush3.bf16.msra.mxu0 %v2581_v15  ;;  %v1145_v41 = vrot.slane %v1143_v35, 4  ;;  %v1148_v42 = vrot.slane %v1146_v36, 5  ;;  %v1113_v43 = vsel %vm2607_vm4, %v1108_v37, %v1112_v20  ;;  %v1135_v45 = vor.u32 %v1134_v38, %v1131_v34  ;;  %v2346_v15 = vld [vmem:[%s2601_s9 + $0x30] ss:$8 sps:$4 sm:$0xff]   ;;  %v562_v58 = vld [vmem:[%s2601_s9 + $0xc] sm:$0x1] }
  0x2f   : > { %2293 = vmatprep.subr.msk.bf16.mxu0 %vm390_vm0, %v2638_v23  ;;  %2145 = vmatprep.mubr.msk.bf16.mxu1 %vm377_vm1, %v2345_v16  ;;  %v1127_v47 = vsel %vm2607_vm4, %v1122_v40, %v1126_v30  ;;  %v1154_v49 = vrot.slane %v1152_v39, 5  ;;  %v582_v61 = vshll.u32 %v559_v54, 16  ;;  %v588_v62 = vshll.u32 %v560_v56, 16  ;;  %v563_v63 = vld [vmem:[%s2601_s9 + $0x10] sm:$0xf] }
  0x30   : > { %v1149_v48 = vor.u32 %v1148_v42, %v1145_v41  ;;  %v1972_v50 = vcombine.low %v1113_v43, %v1127_v47  ;;  %v1136_v51 = vrot.slane %v1135_v45, 4  ;;  %v593_v2 = vshrl.u32 %v561_v57, 16  ;;  %v564_v6 = vld [vmem:[%s2601_s9 + $0x14] sm:$0x1]  ;;  %v565_v11 = vld [vmem:[%s2601_s9 + $0x18] sm:$0xf] }
  0x31   : > { %v596_v4 = vshll.u32 %v561_v57, 16  ;;  %v602_v5 = vshll.u32 %v562_v58, 16  ;;  %v581_v7 = vrot.slane %v579_v60, 4  ;;  %v584_v8 = vrot.slane %v582_v61, 5  ;;  %v566_v18 = vld [vmem:[%s2601_s9 + $0x1c] sm:$0x1] }
  0x32   : > { %v1150_v52 = vrot.slane %v1149_v48, 4  ;;  %2185 = vmatprep.mubr.msk.bf16.mxu0 %vm377_vm1, %v1972_v50  ;;  %v1141_v55 = vsel %vm2607_vm4, %v1136_v51, %v1140_v46  ;;  %v590_v9 = vrot.slane %v588_v62, 5  ;;  %v607_v12 = vshrl.u32 %v563_v63, 16  ;;  %v2348_v29 = vld [vmem:[%s2601_s9 + $0x18] ss:$8 sps:$4 sm:$0xff]  }
  0x33   : > { %v595_v13 = vrot.slane %v593_v2, 4  ;;  %v598_v14 = vrot.slane %v596_v4, 5  ;;  %v604_v17 = vrot.slane %v602_v5, 5  ;;  %v610_v19 = vshll.u32 %v563_v63, 16  ;;  %v2349_v37 = vld [vmem:[%s2601_s9 + $0x28] ss:$8 sps:$4 sm:$0xff]  }
  0x34   : > { %2146 = vmatmul.mubr.msk.bf16.gmra.mrb[4].mxu1 %vm377_vm1, %v2346_v15  ;;  %v1155_v59 = vsel %vm2607_vm4, %v1150_v52, %v1154_v49  ;;  %v585_v20 = vor.u32 %v584_v8, %v581_v7  ;;  %v609_v21 = vrot.slane %v607_v12, 4  ;;  %v616_v22 = vshll.u32 %v564_v6, 16  ;;  %v567_v40 = vld [vmem:[%s2601_s9 + $0x20] sm:$0xf]  ;;  %v568_v45 = vld [vmem:[%s2601_s9 + $0x24] sm:$0x1] }
  0x35   : > { %v1973_v0 = vcombine.low %v1141_v55, %v1155_v59  ;;  %v621_v24 = vshrl.u32 %v565_v11, 16  ;;  %v599_v25 = vor.u32 %v598_v14, %v595_v13  ;;  %v612_v26 = vrot.slane %v610_v19, 5  ;;  %v569_v46 = vld [vmem:[%s2601_s9 + $0x28] sm:$0xf]  ;;  %v570_v48 = vld [vmem:[%s2601_s9 + $0x2c] sm:$0x1] }
  0x36   : > { %v624_v27 = vshll.u32 %v565_v11, 16  ;;  %v630_v28 = vshll.u32 %v566_v18, 16  ;;  %v1421_v30 = vsel %vm390_vm0, %v2638_v23, 0  ;;  %v586_v31 = vrot.slane %v585_v20, 4  ;;  %v2685_v23 = vld [vmem:[%s2843_s4 + $0x20] sm:$0xf] }
  0x37   : > { %2186 = vmatmul.mubr.msk.bf16.gmra.mrb[4].mxu0 %vm377_vm1, %v1973_v0  ;;  %v618_v32 = vrot.slane %v616_v22, 5  ;;  %v623_v33 = vrot.slane %v621_v24, 4  ;;  %v600_v34 = vrot.slane %v599_v25, 4  ;;  %v613_v35 = vor.u32 %v612_v26, %v609_v21  ;;  %v571_v55 = vld [vmem:[%s2601_s9 + $0x30] sm:$0xf] }
  0x38   : > { %2191 = vmatprep.mubr.msk.bf16.mxu0 %vm377_vm1, %v2347_v53  ;;  %v626_v36 = vrot.slane %v624_v27, 5  ;;  %v591_v38 = vsel %vm2607_vm4, %v586_v31, %v590_v9  ;;  %v632_v39 = vrot.slane %v630_v28, 5  ;;  %v835_v16 = vsel %vm390_vm0, %v2626_v10, 0  ;;  %v572_v60 = vld [vmem:[%s2601_s9 + $0x34] sm:$0x1] }
  0x39   : > { %v605_v41 = vsel %vm2607_vm4, %v600_v34, %v604_v17  ;;  %v614_v42 = vrot.slane %v613_v35, 4  ;;  %v635_v15 = vshrl.u32 %v567_v40, 16  ;;  %v638_v49 = vshll.u32 %v567_v40, 16  ;;  %v2350_v62 = vld [vmem:[%s2601_s9 + $0x38] ss:$8 sps:$4 sm:$0xff]  }
  0x3a   : > { %v627_v43 = vor.u32 %v626_v36, %v623_v33  ;;  %v1943_v47 = vcombine.low %v591_v38, %v605_v41  ;;  %v644_v10 = vshll.u32 %v568_v45, 16  ;;  %v649_v50 = vshrl.u32 %v569_v46, 16  ;;  %v573_v0 = vld [vmem:[%s2601_s9 + $0x38] sm:$0xf]  ;;  %v574_v2 = vld [vmem:[%s2601_s9 + $0x3c] sm:$0x1] }
  0x3b   : > { %v619_v51 = vsel %vm2607_vm4, %v614_v42, %v618_v32  ;;  %v637_v53 = vrot.slane %v635_v15, 4  ;;  %v652_v54 = vshll.u32 %v569_v46, 16  ;;  %v640_v56 = vrot.slane %v638_v49, 5  ;;  %v2351_v14 = vld [vmem:[%s2549_s8 + $0x8] ss:$8 sps:$4 sm:$0xff]  }
  0x3c   : > { %v628_v52 = vrot.slane %v627_v43, 4  ;;  %2151 = vmatprep.mubr.msk.bf16.mxu1 %vm377_vm1, %v1943_v47  ;;  %v646_v57 = vrot.slane %v644_v10, 5  ;;  %v651_v58 = vrot.slane %v649_v50, 4  ;;  %v658_v59 = vshll.u32 %v570_v48, 16  ;;  %v2352_v35 = vld [vmem:[%s2549_s8 + $0x18] ss:$8 sps:$4 sm:$0xff]  }
  0x3d   : > { %v654_v63 = vrot.slane %v652_v54, 5  ;;  %v663_v4 = vshrl.u32 %v571_v55, 16  ;;  %v641_v6 = vor.u32 %v640_v56, %v637_v53  ;;  %v666_v8 = vshll.u32 %v571_v55, 16  ;;  %v2013_v40 = vld [vmem:[%s2601_s9 + $0xc] sm:$0x1] }
  0x3e   : > { %v633_v61 = vsel %vm2607_vm4, %v628_v52, %v632_v39  ;;  %v660_v7 = vrot.slane %v658_v59, 5  ;;  %v672_v12 = vshll.u32 %v572_v60, 16  ;;  %v677_v13 = vshrl.u32 %v573_v0, 16  ;;  %v2355_v39 = vld [vmem:[%s2549_s8 + $0x28] ss:$8 sps:$4 sm:$0xff]  }
  0x3f   : > { %2192 = vmatmul.mubr.msk.bf16.vlgmr.msra.gmra.mrb[0].mxu0 %vm377_vm1, %v2348_v29  ;;  %v1944_v5 = vcombine.low %v619_v51, %v633_v61  ;;  %v655_v9 = vor.u32 %v654_v63, %v651_v58  ;;  %v665_v11 = vrot.slane %v663_v4, 4  ;;  %v642_v17 = vrot.slane %v641_v6, 4  ;;  %v2014_v41 = vld [vmem:[%s2601_s9 + $0x10] sm:$0xf]  ;;  %v2015_v42 = vld [vmem:[%s2601_s9 + $0x14] sm:$0x1] }
  0x40   : > { %2200 = vmatpush3.bf16.msra.mxu0 %v1421_v30  ;;  %2195 = vmatprep.mubr.msk.bf16.mxu0 %vm377_vm1, %v2349_v37  ;;  %v668_v18 = vrot.slane %v666_v8, 5  ;;  %v680_v19 = vshll.u32 %v573_v0, 16  ;;  %v686_v20 = vshll.u32 %v574_v2, 16  ;;  %v679_v22 = vrot.slane %v677_v13, 4  ;;  %v2353_v37 = vld [vmem:[%s2573_s21] ss:$8 sps:$4 sm:$0xff]  }
  0x41   : > { %2294 = vmatprep.subr.msk.bf16.mxu0 %vm390_vm0, %v2685_v23  ;;  %2152 = vmatmul.mubr.msk.bf16.vlgmr.msra.gmra.mrb[0].mxu1 %vm377_vm1, %v1944_v5  ;;  %v656_v21 = vrot.slane %v655_v9, 4  ;;  %v647_v24 = vsel %vm2607_vm4, %v642_v17, %v646_v57  ;;  %v674_v26 = vrot.slane %v672_v12, 5  ;;  %v1651_v34 = vsel %vm390_vm0, %v2685_v23, 0  ;;  %v2016_v48 = vld [vmem:[%s2601_s9 + $0x18] sm:$0xf] }
  0x42   : > { %2160 = vmatpush3.bf16.msra.mxu1 %v835_v16  ;;  %v669_v25 = vor.u32 %v668_v18, %v665_v11  ;;  %v682_v27 = vrot.slane %v680_v19, 5  ;;  %v688_v32 = vrot.slane %v686_v20, 5  ;;  %v2012_v16 = vld [vmem:[%s2601_s9 + $0x8] sm:$0xf]  ;;  %v1522_v23 = vshll.u32 %v2013_v40, 16 }
  0x43   : > { %2290 = vmatprep.subr.msk.bf16.mxu1 %vm390_vm0, %v2522_v1  ;;  %v661_v28 = vsel %vm2607_vm4, %v656_v21, %v660_v7  ;;  %v1513_v43 = vshrl.u32 %v2012_v16, 16  ;;  %v1516_v45 = vshll.u32 %v2012_v16, 16  ;;  %v1527_v46 = vshrl.u32 %v2014_v41, 16  ;;  %v2017_v50 = vld [vmem:[%s2601_s9 + $0x1c] sm:$0x1] }
  0x44   : > { %v1945_v29 = vcombine.low %v647_v24, %v661_v28  ;;  %v670_v30 = vrot.slane %v669_v25, 4  ;;  %v683_v31 = vor.u32 %v682_v27, %v679_v22  ;;  %v1530_v15 = vshll.u32 %v2014_v41, 16  ;;  %v2018_v51 = vld [vmem:[%s2601_s9 + $0x20] sm:$0xf]  ;;  %v2354_v52 = vld [vmem:[%s2573_s21 + $0x10] ss:$8 sps:$4 sm:$0xff]  }
  0x45   : > { %v1536_v47 = vshll.u32 %v2015_v42, 16  ;;  %v1515_v49 = vrot.slane %v1513_v43, 4  ;;  %v1518_v10 = vrot.slane %v1516_v45, 5  ;;  %v2356_v53 = vld [vmem:[%s2549_s8 + $0x38] ss:$8 sps:$4 sm:$0xff]   ;;  %v1524_v54 = vrot.slane %v1522_v23, 5 }
  0x46   : > { %2155 = vmatprep.mubr.msk.bf16.mxu1 %vm377_vm1, %v1945_v29  ;;  %v675_v1 = vsel %vm2607_vm4, %v670_v30, %v674_v26  ;;  %v684_v33 = vrot.slane %v683_v31, 4  ;;  %v1529_v55 = vrot.slane %v1527_v46, 4  ;;  %v1532_v56 = vrot.slane %v1530_v15, 5  ;;  %v2019_v58 = vld [vmem:[%s2601_s9 + $0x24] sm:$0x1]  ;;  %s2365_s8 = sshll.u32 %s2425_s18, 4  ;;  %s2366_s8 = int_to_ptr.vmem [resolvable:$false] %s2365_s8 }
  0x47   : > { %2196 = vmatmul.mubr.msk.bf16.gmra.mrb[4].mxu0 %vm377_vm1, %v2350_v62  ;;  %v1538_v57 = vrot.slane %v1536_v47, 5  ;;  %v1519_v59 = vor.u32 %v1518_v10, %v1515_v49  ;;  %v1541_v60 = vshrl.u32 %v2016_v48, 16  ;;  %v1544_v61 = vshll.u32 %v2016_v48, 16  ;;  %v2357_v5 = vld [vmem:[%s2573_s21 + $0x20] ss:$8 sps:$4 sm:$0xff]   ;;  %s2367_s19 = scalar_lea.vmem %s2366_s8, 1024 }
  0x48   : > { %2201 = vmatprep.mubr.msk.bf16.mxu0 %vm377_vm1, %v2351_v14  ;;  %v689_v36 = vsel %vm2607_vm4, %v684_v33, %v688_v32  ;;  %v1550_v62 = vshll.u32 %v2017_v50, 16  ;;  %v1533_v63 = vor.u32 %v1532_v56, %v1529_v55  ;;  %v1555_v0 = vshrl.u32 %v2018_v51, 16  ;;  %v2020_v17 = vld [vmem:[%s2601_s9 + $0x28] sm:$0xf]  ;;  %v2021_v20 = vld [vmem:[%s2601_s9 + $0x2c] sm:$0x1] }
  0x49   : > { %v1946_v38 = vcombine.low %v675_v1, %v689_v36  ;;  %v1558_v2 = vshll.u32 %v2018_v51, 16  ;;  %v1564_v4 = vshll.u32 %v2019_v58, 16  ;;  %v1520_v6 = vrot.slane %v1519_v59, 4  ;;  %v2022_v21 = vld [vmem:[%s2601_s9 + $0x30] sm:$0xf] }
  0x4a   : > { %v1543_v7 = vrot.slane %v1541_v60, 4  ;;  %v1546_v8 = vrot.slane %v1544_v61, 5  ;;  %v1552_v9 = vrot.slane %v1550_v62, 5  ;;  %v1534_v11 = vrot.slane %v1533_v63, 4  ;;  %v2023_v22 = vld [vmem:[%s2601_s9 + $0x34] sm:$0x1] }
  0x4b   : > { %2156 = vmatmul.mubr.msk.bf16.gmra.mrb[4].mxu1 %vm377_vm1, %v1946_v38  ;;  %v1557_v12 = vrot.slane %v1555_v0, 4  ;;  %v1560_v13 = vrot.slane %v1558_v2, 5  ;;  %v1566_v14 = vrot.slane %v1564_v4, 5  ;;  %v1525_v18 = vsel %vm2607_vm4, %v1520_v6, %v1524_v54  ;;  %v2358_v32 = vld [vmem:[%s2573_s21 + $0x30] ss:$8 sps:$4 sm:$0xff]   ;;  %s314_s21 = sand.u32 1, %s2415_s25  }
  0x4c   : > { %2161 = vmatprep.mubr.msk.bf16.mxu1 %vm377_vm1, %v2353_v37  ;;  %v1547_v19 = vor.u32 %v1546_v8, %v1543_v7  ;;  %v1539_v24 = vsel %vm2607_vm4, %v1534_v11, %v1538_v57  ;;  %v1569_v26 = vshrl.u32 %v2020_v17, 16  ;;  %v1572_v27 = vshll.u32 %v2020_v17, 16  ;;  %v2024_v36 = vld [vmem:[%s2601_s9 + $0x38] sm:$0xf]  ;;  %v2025_v16 = vld [vmem:[%s2601_s9 + $0x3c] sm:$0x1] }
  0x4d   : > { %v1561_v25 = vor.u32 %v1560_v13, %v1557_v12  ;;  %v2029_v28 = vcombine.low %v1525_v18, %v1539_v24  ;;  %v1578_v30 = vshll.u32 %v2021_v20, 16  ;;  %v1583_v31 = vshrl.u32 %v2022_v21, 16  ;;  %v2026_v43 = vld [vmem:[%s2601_s9 + $0x40] sm:$0xf]  ;;  %v2027_v45 = vld [vmem:[%s2601_s9 + $0x44] sm:$0x1] }
  0x4e   : > { %v1548_v29 = vrot.slane %v1547_v19, 4  ;;  %v1571_v33 = vrot.slane %v1569_v26, 4  ;;  %v1597_v23 = vshrl.u32 %v2024_v36, 16  ;;  %v2359_v15 = vld [vmem:[%s2558_s14 + $0x20] ss:$8 sps:$4 sm:$0xff]   ;;  %v1600_v48 = vshll.u32 %v2024_v36, 16 }
  0x4f   : > { %2202 = vmatmul.mubr.msk.bf16.vlgmr.msra.gmra.mrb[0].mxu0 %vm377_vm1, %v2352_v35  ;;  %v1562_v1 = vrot.slane %v1561_v25, 4  ;;  %v1586_v35 = vshll.u32 %v2022_v21, 16  ;;  %v1580_v37 = vrot.slane %v1578_v30, 5  ;;  %v1585_v38 = vrot.slane %v1583_v31, 4  ;;  %v2360_v8 = vld [vmem:[%s2558_s14 + $0x30] ss:$8 sps:$4 sm:$0xff]  }
  0x50   : > { %2210 = vmatpush3.bf16.msra.mxu0 %v1651_v34  ;;  %2205 = vmatprep.mubr.msk.bf16.mxu0 %vm377_vm1, %v2355_v39  ;;  %v1574_v34 = vrot.slane %v1572_v27, 5  ;;  %v1592_v39 = vshll.u32 %v2023_v22, 16  ;;  %v1606_v49 = vshll.u32 %v2025_v16, 16  ;;  %v1599_v51 = vrot.slane %v1597_v23, 4  ;;  %v2037_v18 = vld [vmem:[%s2844_s5] ss:$0 sm:$0xff] }
  0x51   : > { %v1567_v40 = vsel %vm2607_vm4, %v1562_v1, %v1566_v14  ;;  %v1588_v42 = vrot.slane %v1586_v35, 5  ;;  %v1614_v54 = vshll.u32 %v2026_v43, 16  ;;  %v1620_v55 = vshll.u32 %v2027_v45, 16  ;;  %v2038_v20 = vld [vmem:[%s2845_s6] ss:$0 sm:$0xff]  ;;  %s1920_s23 = sshll.u32 %s314_s21, 5 }
  0x52   : > { %v1575_v41 = vor.u32 %v1574_v34, %v1571_v33  ;;  %v1594_v47 = vrot.slane %v1592_v39, 5  ;;  %v1608_v60 = vrot.slane %v1606_v49, 5  ;;  %s316_s29 = scalar_lea.vmem [#allocation2], %s1920_s23  ;;  %s2060_s9 = sshll.u32 %s2489_s28, 9 }
  0x53   : > { %2162 = vmatmul.mubr.msk.bf16.vlgmr.msra.gmra.mrb[0].mxu1 %vm377_vm1, %v2354_v52  ;;  %v1589_v50 = vor.u32 %v1588_v42, %v1585_v38  ;;  %v1611_v52 = vshrl.u32 %v2026_v43, 16  ;;  %v1616_v61 = vrot.slane %v1614_v54, 5  ;;  %v1622_v4 = vrot.slane %v1620_v55, 5  ;;  %s1818_s22 = sshll.u32 %s316_s29, 4  ;;  %s2792_s16 = scalar_lea.hbm %s2846_s7, %s2060_s9  ;;  %s2794_s22 = int_to_ptr.vmem [resolvable:$true] %s1818_s22 }
  0x54   : > { %2220 = vmatpush3.bf16.msra.mxu1 %v2531_v3  ;;  %2165 = vmatprep.mubr.msk.bf16.mxu1 %vm377_vm1, %v2357_v5  ;;  %v1553_v3 = vsel %vm2607_vm4, %v1548_v29, %v1552_v9  ;;  %v1576_v10 = vrot.slane %v1575_v41, 4  ;;  %s2798_s28 = scalar_lea.sflag [#allocation3], %s314_s21  ;;  %s2361_s17 = scalar_lea.vmem %s2794_s22, 512 }
  0x55   : > { %v2030_v46 = vcombine.low %v1553_v3, %v1567_v40  ;;  %v1590_v57 = vrot.slane %v1589_v50, 4  ;;  %v1613_v58 = vrot.slane %v1611_v52, 4  ;;  %p2362_p11 = scmp.ne.s32.totalorder %s2794_s22, %s2361_s17  ;;  %p2368_p0 = scmp.lt.s32.totalorder %s2794_s22, %s2366_s8 }
  0x56   : > { %v1581_v56 = vsel %vm2607_vm4, %v1576_v10, %v1580_v37  ;;  %p2369_p1 = scmp.lt.s32.totalorder %s2367_s19, %s2361_s17 }
  0x57   : > { %2206 = vmatmul.mubr.msk.bf16.gmra.mrb[4].mxu0 %vm377_vm1, %v2356_v53  ;;  %v1602_v53 = vrot.slane %v1600_v48, 5  ;;  %v1595_v62 = vsel %vm2607_vm4, %v1590_v57, %v1594_v47  ;;  %v1617_v2 = vor.u32 %v1616_v61, %v1613_v58  ;;  %p2363_p12 = pnand %p2362_p11, %p2506_p5 }
  0x58   : > { %2211 = vmatprep.mubr.msk.bf16.mxu0 %vm377_vm1, %v2029_v28  ;;  %v2031_v63 = vcombine.low %v1581_v56, %v1595_v62  ;;  %p2370_p2 = por %p2369_p1, %p2368_p0 }
  0x59   : > { %v1603_v59 = vor.u32 %v1602_v53, %v1599_v51  ;;  %v1618_v6 = vrot.slane %v1617_v2, 4  ;;  %p2364_p13 = pneg %p2363_p12 }
  0x5b   : > { %2166 = vmatmul.mubr.msk.bf16.gmra.mrb[4].mxu1 %vm377_vm1, %v2358_v32  ;;  %v1604_v0 = vrot.slane %v1603_v59, 4  ;;  %v1623_v7 = vsel %vm2607_vm4, %v1618_v6, %v1622_v4  ;;  %p2371_p3 = pnand %p2370_p2, %p2364_p13 }
  0x5c   : > { %2175 = vmatprep.mubr.msk.bf16.mxu1 %vm377_vm1, %v2359_v15 }
  0x5d   : > { %v1609_v5 = vsel %vm2607_vm4, %v1604_v0, %v1608_v60 }
  0x5e   : > { %v2032_v9 = vcombine.low %v1609_v5, %v1623_v7 }
  0x5f   : > { %2212 = vmatmul.mubr.msk.bf16.vlgmr.msra.gmra.mrb[0].mxu0 %vm377_vm1, %v2030_v46 }
  0x60   : > { %2215 = vmatprep.mubr.msk.bf16.mxu0 %vm377_vm1, %v2031_v63 }
  0x67   : > { %2216 = vmatmul.mubr.msk.bf16.gmra.mrb[4].mxu0 %vm377_vm1, %v2032_v9  ;;  %2176 = vmatmul.mubr.msk.bf16.vlgmr.msra.gmra.mrb[4].mxu1 %vm377_vm1, %v2360_v8 }
 0x126   : > { %v2163_v11 = vpop.f32.mrb[0].mxu1 }
 0x127   : > { %v871_v12 = vpop.f32.mrb[1].mxu1 }
 0x128   : > { %v2164_v13 = vpop.f32.mrb[2].mxu1 }
 0x129   : > { %v874_v14 = vpop.f32.mrb[3].mxu1 }
 0x132   : > { %v2213_v17 = vpop.f32.mrb[0].mxu0 }
 0x133   : > { %v2221_v19 = vadd.f32 %v2213_v17, %v2163_v11  ;;  %v1687_v44 = vpop.f32.mrb[1].mxu0 }
 0x134   : > { %v2222_v21 = vadd.f32 %v1687_v44, %v871_v12  ;;  %v2214_v22 = vpop.f32.mrb[2].mxu0 }
 0x135   : > { %v1735_v24 = vmul.f32 %v2221_v19, %v2037_v18  ;;  %v2223_v25 = vadd.f32 %v2214_v22, %v2164_v13  ;;  %v1690_v26 = vpop.f32.mrb[3].mxu0 }
 0x136   : > { %v1733_v27 = vmul.f32 %v2222_v21, %v2037_v18  ;;  %v2224_v28 = vadd.f32 %v1690_v26, %v874_v14 }
 0x137   : > { %v1750_v29 = vadd.f32 %v2038_v20, %v1735_v24  ;;  %v1736_v30 = vmul.f32 %v2223_v25, %v2037_v18 }
 0x138   : > { %v1748_v31 = vadd.f32 %v2038_v20, %v1733_v27  ;;  %v1734_v32 = vmul.f32 %v2224_v28, %v2037_v18 }
 0x139   : > { %v1751_v1 = vadd.f32 %v2038_v20, %v1736_v30  ;;  %v1758_v34 = vmax.f32 %v1750_v29, 0.0 }
 0x13a   : > { %v1749_v33 = vadd.f32 %v2038_v20, %v1734_v32  ;;  %v1756_v36 = vmax.f32 %v1748_v31, 0.0  ;;  %v2217_v37 = vpop.f32.mrb[4].mxu0  ;;  %v2177_v40 = vpop.f32.mrb[4].mxu1 }
 0x13b   : > { %v1759_v35 = vmax.f32 %v1751_v1, 0.0  ;;  %v1703_v39 = vpop.f32.mrb[5].mxu0  ;;  %v2225_v42 = vadd.f32 %v2217_v37, %v2177_v40  ;;  %v1005_v43 = vpop.f32.mrb[5].mxu1 }
 0x13c   : > { %v1757_v3 = vmax.f32 %v1749_v33, 0.0  ;;  %v2218_v41 = vpop.f32.mrb[6].mxu0  ;;  %v2226_v23 = vadd.f32 %v1703_v39, %v1005_v43  ;;  %v2178_v46 = vpop.f32.mrb[6].mxu1 }
 0x13d   : > { %v2069_v38 = vpack.c.bf16 %v1759_v35, %v1758_v34  ;;  %v1706_v45 = vpop.f32.mrb[7].mxu0  ;;  %v1739_v15 = vmul.f32 %v2225_v42, %v2037_v18  ;;  %v2227_v47 = vadd.f32 %v2218_v41, %v2178_v46  ;;  %v1008_v48 = vpop.f32.mrb[7].mxu1 }
 0x13e   : > { %v2064_v16 = vpack.c.bf16 %v1757_v3, %v1756_v36  ;;  %v1737_v49 = vmul.f32 %v2226_v23, %v2037_v18  ;;  %v2228_v10 = vadd.f32 %v1706_v45, %v1008_v48 }
 0x13f   : > { %2081 = vst [vmem:[%s316_s29 + $0x8] sm:$0xff] %v2069_v38   ;;  %v1754_v50 = vadd.f32 %v2038_v20, %v1739_v15  ;;  %v1740_v51 = vmul.f32 %v2227_v47, %v2037_v18 }
 0x140   : > { %2065 = vst [vmem:[%s316_s29] sm:$0xff] %v2064_v16   ;;  %v1752_v52 = vadd.f32 %v2038_v20, %v1737_v49  ;;  %v1738_v53 = vmul.f32 %v2228_v10, %v2037_v18 }
 0x141   : > { %v1755_v54 = vadd.f32 %v2038_v20, %v1740_v51  ;;  %v1762_v56 = vmax.f32 %v1754_v50, 0.0 }
 0x142   : > { %v1753_v55 = vadd.f32 %v2038_v20, %v1738_v53  ;;  %v1760_v58 = vmax.f32 %v1752_v52, 0.0 }
 0x143   : > { %v1763_v57 = vmax.f32 %v1755_v54, 0.0 }
 0x144   : > { %v1761_v59 = vmax.f32 %v1753_v55, 0.0 }
 0x145   : > { %v2079_v60 = vpack.c.bf16 %v1763_v57, %v1762_v56 }
 0x146   : > { %v2074_v61 = vpack.c.bf16 %v1761_v59, %v1760_v58 }
 0x147   : > { %2083 = vst [vmem:[%s316_s29 + $0x18] sm:$0xff] %v2079_v60  }
 0x148   : > { %2082 = vst [vmem:[%s316_s29 + $0x10] sm:$0xff] %v2074_v61  }
 0x149   : > { %2374 = shalt.err (!%p2371_p3)
}
 0x14a   : > { %s2375_s20 = scalar_lea.hbm %s2792_s16, 512  ;;  %s2379_s23 = scalar_lea.hbm %s2846_s7, 1024 }
 0x14b   : > { %p2376_p4 = scmp.ne.s32.totalorder %s2792_s16, %s2375_s20  ;;  %p2380_p9 = scmp.lt.u32.totalorder %s2792_s16, %s2846_s7 }
 0x14c   : > { %p2381_p10 = scmp.lt.u32.totalorder %s2379_s23, %s2375_s20  ;;  %p2383_p12 = scmp.lt.u32.totalorder %s2375_s20, %s2792_s16 }
 0x14d   : > { %p2377_p7 = pnand %p2376_p4, %p2506_p5 }
 0x14e   : > { %p2382_p11 = por %p2381_p10, %p2380_p9 }
 0x14f   : > { %p2378_p8 = pneg %p2377_p7 }
 0x150   : > { %p2384_p13 = por %p2383_p12, %p2382_p11 }
 0x152   : > { %p2385_p0 = pnand %p2384_p13, %p2378_p8 }
 0x154   : > { %2388 = shalt.err (!%p2385_p0)
}
 0x155   : > { %s2426_s13 = smov 64   ;;  %s2427_s15 = smov 4  }
 0x156   : > { %2296 = dma.vmem_to_hbm [thread:$0]  (%p2506_p5), %s2794_s22, 512, %s2792_s16, %s2798_s28, %s2426_s13, %s2426_s13, %s2427_s15  }
 0x157 PF: > { %p2302_p1 = scmp.ge.s32.totalorder %s2423_s27, 2  ;;  %s1833_s17 = sand.u32 1, %s2411_s24  }
 0x158   : > { %s1834_s18 = scalar_lea.sflag [#allocation3], %s1833_s17 }
 0x159   : > { %p2299_p2 = pnand %p2302_p1, %p2510_p6 }
 0x15b   : > { %2406 = dma.done.wait (!%p2299_p2), %s1834_s18, 512  }
 0x15c   : > { %2408 = vsyncadd (!%p2299_p2), %s1834_s18, 4294966784  ;;  %p17_p3 = scmp.ge.s32.totalorder %s2493_s30, 4   ;;  %s2851_s24 = smov %s2415_s25 }
 0x15d   : > { %s2852_s25 = smov %s2419_s26  ;;  %s2853_s26 = smov %s2504_s10 }
 0x15e   : > { %s2854_s27 = smov %s2493_s30  ;;  %19 = sbr.rel (!%p17_p3) target bundleno = 3 (0x3), region = 102 }
 0x165   :  { %1839 = vsyncpa [#allocation3], 1 }
 0x166   :  { %1841 = vsyncpa [#allocation3 + $0x1], 1 }

</bundles_post_ra>
